<compile_context>
chip_gen: v5e
topology: v5e:2x2
jax: 0.10.0
libtpu: 0.0.40
codegen_flags: <defaults>
</compile_context>

<pallas_src>
import functools
import numpy as np
import jax
import jax.numpy as jnp
from jax.experimental import pallas as pl
from jax.experimental.pallas import tpu as pltpu

D_MODEL = 32
D_FF = 64
NUM_HEAD = 4
D_K = D_MODEL // NUM_HEAD
LN_EPS = 1e-6
VEC_ROW = 128  # lane-aligned row width of the bias/LN slab

MAX_ROWS_PER_STEP = 4096        # raised from 512: per-step pipeline overhead dominates at D=32
MAX_ATTN_BLOCK_BYTES = 8 << 20  # keep the double-buffered attn block <= 16 MiB (v7x VMEM = 64 MiB)


def _choose_b_blk(B, L, attn_bytes_per_batch):
    """Largest divisor of B such that one grid step stays within the row / VMEM caps and,
    when B >= 2, at least two grid steps remain (feeds both v7x TensorCores via "parallel")."""
    best = 1
    for d in range(1, B + 1):
        if B % d:
            continue
        if d * L > MAX_ROWS_PER_STEP:
            break
        if d * attn_bytes_per_batch > MAX_ATTN_BLOCK_BYTES:
            break
        if B >= 2 and B // d < 2:
            continue
        best = d
    return best


def encoder_layer_kernel(x_ref, w_ref, w2_ref, vec_ref, out_ref, *attn_out,
                         b_blk, seq_len, compute_dtype, return_attn):
    D, H, DK, DFF, L = D_MODEL, NUM_HEAD, D_K, D_FF, seq_len
    R = b_blk * L
    attn_ref = attn_out[0] if return_attn else None

    x = x_ref[...].astype(jnp.float32).reshape(R, D)        # (R, D) row slab, f32
    xc = x.astype(compute_dtype)                            # MXU operand dtype

    # --- packed parameters (static slices); weights already in compute dtype ---
    W = w_ref[...]                                          # (D, 3D + D_FF + D)
    wqkv = W[:, 0:3 * D]                                    # (D, 3D)  (q cols pre-scaled)
    w1 = W[:, 3 * D:3 * D + DFF]                            # (D, D_FF)
    wo = W[:, 3 * D + DFF:3 * D + DFF + D]                  # (D, D)

    vec = vec_ref[...]                                      # (8, 128) f32 biases / LN params
    bqkv = vec[0:1, 0:3 * D]
    b1 = vec[1:2, 0:DFF]
    bo = vec[2:3, 0:D]
    b2 = vec[3:4, 0:D]
    g1 = vec[4:5, 0:D]
    beta1 = vec[5:6, 0:D]
    g2 = vec[6:7, 0:D]
    beta2 = vec[7:8, 0:D]

    # --- fused QKV projection (single MXU matmul, f32 accumulation) ---
    qkv = jnp.dot(xc, wqkv, preferred_element_type=jnp.float32) + bqkv   # (R, 3D)

    # --- multi-head attention: leading-batch-dim 3D einsums, heads statically unrolled ---
    ctx_heads = []
    for h in range(H):
        qh = qkv[:, h * DK:(h + 1) * DK].reshape(b_blk, L, DK)
        kh = qkv[:, D + h * DK:D + (h + 1) * DK].reshape(b_blk, L, DK)
        vh = qkv[:, 2 * D + h * DK:2 * D + (h + 1) * DK].reshape(b_blk, L, DK)

        s = jnp.einsum('bqd,bkd->bqk',
                       qh.astype(compute_dtype), kh.astype(compute_dtype),
                       preferred_element_type=jnp.float32)  # (B_BLK, L, L), scale folded in
        # softmax over keys -- kept in f32 (VPU/EUP elementwise path)
        s = s - jnp.max(s, axis=-1, keepdims=True)
        e = jnp.exp(s)
        inv = pl.reciprocal(jnp.sum(e, axis=-1, keepdims=True), approx=True)
        a = e * inv

        if return_attn:
            # Per-head static-slice store: bounds the live range to one head (no stack,
            # no spill at large L); the block already spans full (H, L, L) extents so the
            # HBM writeback is one contiguous DMA per grid step.
            attn_ref[:, h:h + 1, :, :] = a.reshape(b_blk, 1, L, L).astype(attn_ref.dtype)

        ctx = jnp.einsum('bqk,bkd->bqd',
                         a.astype(compute_dtype), vh.astype(compute_dtype),
                         preferred_element_type=jnp.float32)  # (B_BLK, L, DK)
        ctx_heads.append(ctx.reshape(R, DK))

    # --- single K=32 output projection (one MXU push instead of four K=8 pushes) ---
    ctx_all = jnp.concatenate(ctx_heads, axis=-1)            # (R, D)
    o = jnp.dot(ctx_all.astype(compute_dtype), wo, preferred_element_type=jnp.float32) + bo

    # --- residual + LayerNorm 1 (f32) ---
    y = o + x
    mu = jnp.mean(y, axis=-1, keepdims=True)
    var = jnp.mean((y - mu) ** 2, axis=-1, keepdims=True)
    y = (y - mu) * jax.lax.rsqrt(var + LN_EPS) * g1 + beta1

    # --- Positionwise FFN (MXU in compute dtype, ReLU / bias in f32) ---
    h1 = jnp.dot(y.astype(compute_dtype), w1, preferred_element_type=jnp.float32) + b1
    h1 = jnp.maximum(h1, 0.0)
    h2 = jnp.dot(h1.astype(compute_dtype), w2_ref[...], preferred_element_type=jnp.float32) + b2

    # --- residual + LayerNorm 2 (f32) ---
    z = h2 + y
    mu2 = jnp.mean(z, axis=-1, keepdims=True)
    var2 = jnp.mean((z - mu2) ** 2, axis=-1, keepdims=True)
    z = (z - mu2) * jax.lax.rsqrt(var2 + LN_EPS) * g2 + beta2

    out_ref[...] = z.reshape(b_blk, L, D).astype(out_ref.dtype)


def encoder_layer(x, params, *, return_attn=True, attn_dtype=jnp.float32,
                  mxu_dtype=jnp.float32):
    """Returns (out, attn) like the PyTorch module; attn is None when return_attn=False.

    mxu_dtype=jnp.bfloat16 feeds the MXU bf16 operands (v6e/v7x fast path) while keeping
    f32 accumulation and f32 softmax/LayerNorm; attn_dtype=jnp.bfloat16 halves the O(L^2)
    attention writeback bandwidth."""
    (wq, bq, wk, bk, wv, bv, wo, bo, g1, beta1,
     w1, b1, w2, b2, g2, beta2) = params
    x = x.astype(jnp.float32)
    B, L, D = x.shape
    assert D == D_MODEL
    assert 3 * D_MODEL <= VEC_ROW and D_FF <= VEC_ROW

    # Fold the 1/sqrt(d_k) scale into the Q projection (free).
    scale = 1.0 / float(np.sqrt(D_K))
    wqkv = jnp.concatenate([wq * scale, wk, wv], axis=1)     # (D, 3D)
    bqkv = jnp.concatenate([bq * scale, bk, bv], axis=1)     # (1, 3D)

    # Weight slab: [wqkv | w1 | wo] -> (D, 3D + D_FF + D), cast to the MXU operand dtype.
    w_slab = jnp.concatenate([wqkv, w1, wo], axis=1).astype(mxu_dtype)
    w2_c = w2.astype(mxu_dtype)

    # Bias / LayerNorm slab, one lane-aligned row per vector -> (8, 128), kept in f32.
    def _row(v):
        return jnp.pad(v, ((0, 0), (0, VEC_ROW - v.shape[1])))
    vec_slab = jnp.concatenate(
        [_row(bqkv), _row(b1), _row(bo), _row(b2),
         _row(g1), _row(beta1), _row(g2), _row(beta2)], axis=0).astype(jnp.float32)

    attn_itemsize = jnp.dtype(attn_dtype).itemsize
    attn_bytes_per_batch = NUM_HEAD * L * L * attn_itemsize if return_attn else 0
    b_blk = _choose_b_blk(B, L, attn_bytes_per_batch)
    nb = B // b_blk

    kernel = functools.partial(
        encoder_layer_kernel, b_blk=b_blk, seq_len=L,
        compute_dtype=mxu_dtype, return_attn=return_attn)

    in_specs = [
        pl.BlockSpec((b_blk, L, D), lambda i: (i, 0, 0)),
        pl.BlockSpec(w_slab.shape, lambda i: (0, 0)),
        pl.BlockSpec(w2_c.shape, lambda i: (0, 0)),
        pl.BlockSpec(vec_slab.shape, lambda i: (0, 0)),
    ]
    out_specs = [pl.BlockSpec((b_blk, L, D), lambda i: (i, 0, 0))]
    out_shape = [jax.ShapeDtypeStruct((B, L, D), jnp.float32)]
    if return_attn:
        out_specs.append(pl.BlockSpec((b_blk, NUM_HEAD, L, L), lambda i: (i, 0, 0, 0)))
        out_shape.append(jax.ShapeDtypeStruct((B, NUM_HEAD, L, L), attn_dtype))

    # Advisory cost estimate for XLA's scheduler.
    mxu_itemsize = jnp.dtype(mxu_dtype).itemsize
    flops = (2 * B * L * D * (3 * D)                 # fused QKV projection
             + 2 * B * NUM_HEAD * L * L * D_K * 2    # scores + context
             + 2 * B * L * D * D                     # output projection
             + 2 * B * L * D * D_FF * 2)             # FFN
    transcendentals = B * NUM_HEAD * L * L + 4 * B * L
    bytes_accessed = (2 * B * L * D * 4
                      + (B * NUM_HEAD * L * L * attn_itemsize if return_attn else 0)
                      + (w_slab.size + w2_c.size) * mxu_itemsize
                      + vec_slab.size * 4)
    cost = pl.CostEstimate(flops=int(flops), transcendentals=int(transcendentals),
                           bytes_accessed=int(bytes_accessed))

    # Explicit VMEM budget (blocks are double-buffered by the pipeline).
    per_step_bytes = (2 * b_blk * L * D * 4
                      + b_blk * attn_bytes_per_batch
                      + (w_slab.size + w2_c.size) * mxu_itemsize
                      + vec_slab.size * 4)
    vmem_limit = int(min(64 << 20, max(32 << 20, 4 * per_step_bytes)))

    grid_spec = pltpu.PrefetchScalarGridSpec(
        num_scalar_prefetch=0,
        grid=(nb,),
        in_specs=in_specs,
        out_specs=tuple(out_specs),
    )
    outs = pl.pallas_call(
        kernel,
        grid_spec=grid_spec,
        out_shape=tuple(out_shape),
        compiler_params=pltpu.CompilerParams(
            dimension_semantics=("parallel",),
            vmem_limit_bytes=vmem_limit),
        cost_estimate=cost,
    )(x, w_slab, w2_c, vec_slab)

    if return_attn:
        return outs[0], outs[1]
    return outs[0], None


def init_params(key):
    ks = jax.random.split(key, 12)
    std = 0.05
    wq = jax.random.normal(ks[0], (D_MODEL, NUM_HEAD * D_K), jnp.float32) * std
    wk = jax.random.normal(ks[1], (D_MODEL, NUM_HEAD * D_K), jnp.float32) * std
    wv = jax.random.normal(ks[2], (D_MODEL, NUM_HEAD * D_K), jnp.float32) * std
    wo = jax.random.normal(ks[3], (NUM_HEAD * D_K, D_MODEL), jnp.float32) * std
    w1 = jax.random.normal(ks[4], (D_MODEL, D_FF), jnp.float32) * std
    w2 = jax.random.normal(ks[5], (D_FF, D_MODEL), jnp.float32) * std
    bq = jax.random.normal(ks[6], (1, D_MODEL), jnp.float32) * std
    bk = jax.random.normal(ks[7], (1, D_MODEL), jnp.float32) * std
    bv = jax.random.normal(ks[8], (1, D_MODEL), jnp.float32) * std
    bo = jax.random.normal(ks[9], (1, D_MODEL), jnp.float32) * std
    b1 = jax.random.normal(ks[10], (1, D_FF), jnp.float32) * std
    b2 = jax.random.normal(ks[11], (1, D_MODEL), jnp.float32) * std
    g1 = jnp.ones((1, D_MODEL), jnp.float32)
    beta1 = jnp.zeros((1, D_MODEL), jnp.float32)
    g2 = jnp.ones((1, D_MODEL), jnp.float32)
    beta2 = jnp.zeros((1, D_MODEL), jnp.float32)
    return (wq, bq, wk, bk, wv, bv, wo, bo, g1, beta1,
            w1, b1, w2, b2, g2, beta2)


def encoder_layer_ref(x, params):
    """Pure-JAX reference (mirrors the PyTorch forward in eval mode)."""
    (wq, bq, wk, bk, wv, bv, wo, bo, g1, beta1,
     w1, b1, w2, b2, g2, beta2) = params
    B, L, D = x.shape
    q = x @ wq + bq
    k = x @ wk + bk
    v = x @ wv + bv
    q = q.reshape(B, L, NUM_HEAD, D_K).transpose(0, 2, 1, 3)
    k = k.reshape(B, L, NUM_HEAD, D_K).transpose(0, 2, 1, 3)
    v = v.reshape(B, L, NUM_HEAD, D_K).transpose(0, 2, 1, 3)
    s = jnp.einsum("bhqd,bhkd->bhqk", q, k) / jnp.sqrt(jnp.float32(D_K))
    a = jax.nn.softmax(s, axis=-1)
    o = jnp.einsum("bhqk,bhkd->bhqd", a, v).transpose(0, 2, 1, 3).reshape(B, L, D)
    o = o @ wo + bo
    y = o + x
    mu = y.mean(-1, keepdims=True)
    var = ((y - mu) ** 2).mean(-1, keepdims=True)
    y = (y - mu) * jax.lax.rsqrt(var + LN_EPS) * g1 + beta1
    h = jnp.maximum(y @ w1 + b1, 0.0)
    h = h @ w2 + b2
    z = h + y
    mu2 = z.mean(-1, keepdims=True)
    var2 = ((z - mu2) ** 2).mean(-1, keepdims=True)
    z = (z - mu2) * jax.lax.rsqrt(var2 + LN_EPS) * g2 + beta2
    return z, a


if __name__ == "__main__":
    key = jax.random.PRNGKey(0)
    kx, kp = jax.random.split(key)
    params = init_params(kp)

    # 1) Small sequence (B=2, L=8) -- f32 MXU path (tolerance loosened slightly for the
    #    approx (EUP) reciprocal in the softmax denominator).
    B, L = 2, 8
    x = jax.random.normal(kx, (B, L, D_MODEL), jnp.float32)
    out, attn = encoder_layer(x, params)
    out = jax.block_until_ready(out)
    attn = jax.block_until_ready(attn)
    out_exp, attn_exp = encoder_layer_ref(x, params)
    np.testing.assert_allclose(np.asarray(out), np.asarray(out_exp), rtol=2e-3, atol=2e-3)
    np.testing.assert_allclose(np.asarray(attn), np.asarray(attn_exp), rtol=2e-3, atol=2e-3)

    # 2) Lane-dense sequence length (L=128): exercises the per-head attention store path
    #    at a shape where the (L, L) tiles are unmasked vector stores.
    x2 = jax.random.normal(jax.random.PRNGKey(1), (B, 128, D_MODEL), jnp.float32)
    out2, attn2 = encoder_layer(x2, params)
    out2 = jax.block_until_ready(out2)
    out2_exp, attn2_exp = encoder_layer_ref(x2, params)
    np.testing.assert_allclose(np.asarray(out2), np.asarray(out2_exp), rtol=2e-3, atol=2e-3)
    np.testing.assert_allclose(np.asarray(attn2), np.asarray(attn2_exp), rtol=2e-3, atol=2e-3)

    # 3) bf16 MXU operands + bf16 attention writeback (v6e/v7x fast path); accumulation,
    #    softmax and LayerNorm remain f32, so only operand-quantization error remains.
    out3, attn3 = encoder_layer(x2, params, mxu_dtype=jnp.bfloat16, attn_dtype=jnp.bfloat16)
    out3 = jax.block_until_ready(out3)
    np.testing.assert_allclose(np.asarray(out3), np.asarray(out2_exp), rtol=4e-2, atol=4e-2)
    np.testing.assert_allclose(np.asarray(attn3.astype(jnp.float32)), np.asarray(attn2_exp),
                               rtol=4e-2, atol=4e-2)

    # 4) Attention-probability output disabled (pure bandwidth win for callers that drop it).
    out4, attn4 = encoder_layer(x, params, return_attn=False)
    out4 = jax.block_until_ready(out4)
    assert attn4 is None
    np.testing.assert_allclose(np.asarray(out4), np.asarray(out_exp), rtol=2e-3, atol=2e-3)

    print("KERNEL_OK")
</pallas_src>

<mosaic_0001>
module attributes {stable_mosaic.version = 11 : i64} {
  func.func @encoder_layer_kernel(%arg0: i32, %arg1: memref<1x8x32xf32, #tpu.memory_space<vmem>>, %arg2: memref<32x192xf32, #tpu.memory_space<vmem>>, %arg3: memref<64x32xf32, #tpu.memory_space<vmem>>, %arg4: memref<8x128xf32, #tpu.memory_space<vmem>>, %arg5: memref<1x8x32xf32, #tpu.memory_space<vmem>>, %arg6: memref<1x4x8x8xf32, #tpu.memory_space<vmem>>) attributes {dimension_semantics = [#tpu.dimension_semantics<parallel>], iteration_bounds = array<i64: 2>, scalar_prefetch = 0 : i64, scratch_operands = 0 : i64, tpu.core_type = #tpu.core_type<tc>, window_params = [{transform_indices = @transform_0, window_bounds = array<i64: 1, 8, 32>}, {pipeline_mode = #tpu.pipeline_mode<synchronous>, transform_indices = @transform_1, window_bounds = array<i64: 32, 192>}, {pipeline_mode = #tpu.pipeline_mode<synchronous>, transform_indices = @transform_2, window_bounds = array<i64: 64, 32>}, {pipeline_mode = #tpu.pipeline_mode<synchronous>, transform_indices = @transform_3, window_bounds = array<i64: 8, 128>}, {transform_indices = @transform_4, window_bounds = array<i64: 1, 8, 32>}, {transform_indices = @transform_5, window_bounds = array<i64: 1, 4, 8, 8>}]} {
    %c0 = arith.constant 0 : index
    %c0_0 = arith.constant 0 : index
    %c0_1 = arith.constant 0 : index
    %0 = vector.load %arg1[%c0, %c0_0, %c0_1] : memref<1x8x32xf32, #tpu.memory_space<vmem>>, vector<1x8x32xf32>
    %1 = vector.shape_cast %0 : vector<1x8x32xf32> to vector<8x32xf32>
    %c0_2 = arith.constant 0 : index
    %c0_3 = arith.constant 0 : index
    %2 = vector.load %arg2[%c0_2, %c0_3] : memref<32x192xf32, #tpu.memory_space<vmem>>, vector<32x192xf32>
    %3 = vector.extract_strided_slice %2 {offsets = [0, 0], sizes = [32, 96], strides = [1, 1]} : vector<32x192xf32> to vector<32x96xf32>
    %4 = vector.extract_strided_slice %2 {offsets = [0, 96], sizes = [32, 64], strides = [1, 1]} : vector<32x192xf32> to vector<32x64xf32>
    %5 = vector.extract_strided_slice %2 {offsets = [0, 160], sizes = [32, 32], strides = [1, 1]} : vector<32x192xf32> to vector<32x32xf32>
    %c0_4 = arith.constant 0 : index
    %c0_5 = arith.constant 0 : index
    %6 = vector.load %arg4[%c0_4, %c0_5] : memref<8x128xf32, #tpu.memory_space<vmem>>, vector<8x128xf32>
    %7 = vector.extract_strided_slice %6 {offsets = [0, 0], sizes = [1, 96], strides = [1, 1]} : vector<8x128xf32> to vector<1x96xf32>
    %8 = vector.extract_strided_slice %6 {offsets = [1, 0], sizes = [1, 64], strides = [1, 1]} : vector<8x128xf32> to vector<1x64xf32>
    %9 = vector.extract_strided_slice %6 {offsets = [2, 0], sizes = [1, 32], strides = [1, 1]} : vector<8x128xf32> to vector<1x32xf32>
    %10 = vector.extract_strided_slice %6 {offsets = [3, 0], sizes = [1, 32], strides = [1, 1]} : vector<8x128xf32> to vector<1x32xf32>
    %11 = vector.extract_strided_slice %6 {offsets = [4, 0], sizes = [1, 32], strides = [1, 1]} : vector<8x128xf32> to vector<1x32xf32>
    %12 = vector.extract_strided_slice %6 {offsets = [5, 0], sizes = [1, 32], strides = [1, 1]} : vector<8x128xf32> to vector<1x32xf32>
    %13 = vector.extract_strided_slice %6 {offsets = [6, 0], sizes = [1, 32], strides = [1, 1]} : vector<8x128xf32> to vector<1x32xf32>
    %14 = vector.extract_strided_slice %6 {offsets = [7, 0], sizes = [1, 32], strides = [1, 1]} : vector<8x128xf32> to vector<1x32xf32>
    %cst = arith.constant dense<0.000000e+00> : vector<8x96xf32>
    %15 = tpu.matmul %1, %3, %cst {dimension_numbers = #tpu.dot_dimension_numbers<[1], [0], [0], [1], [0, 0, 1, 1], [], []>} : vector<8x32xf32>, vector<32x96xf32>, vector<8x96xf32> -> vector<8x96xf32>
    %16 = vector.broadcast %7 : vector<1x96xf32> to vector<8x96xf32>
    %17 = arith.addf %15, %16 : vector<8x96xf32>
    %18 = vector.extract_strided_slice %17 {offsets = [0, 0], sizes = [8, 8], strides = [1, 1]} : vector<8x96xf32> to vector<8x8xf32>
    %19 = vector.shape_cast %18 : vector<8x8xf32> to vector<1x8x8xf32>
    %20 = vector.extract_strided_slice %17 {offsets = [0, 32], sizes = [8, 8], strides = [1, 1]} : vector<8x96xf32> to vector<8x8xf32>
    %21 = vector.shape_cast %20 : vector<8x8xf32> to vector<1x8x8xf32>
    %22 = vector.extract_strided_slice %17 {offsets = [0, 64], sizes = [8, 8], strides = [1, 1]} : vector<8x96xf32> to vector<8x8xf32>
    %23 = vector.shape_cast %22 : vector<8x8xf32> to vector<1x8x8xf32>
    "tpu.trace_start"() <{level = 10 : i32, message = "bqd,bkd->bqk"}> : () -> ()
    %cst_6 = arith.constant dense<0.000000e+00> : vector<1x8x8xf32>
    %24 = tpu.matmul %19, %21, %cst_6 {dimension_numbers = #tpu.dot_dimension_numbers<[2], [2], [1], [1], [0, 0, 0, 1, 1, 1], [0], [0]>} : vector<1x8x8xf32>, vector<1x8x8xf32>, vector<1x8x8xf32> -> vector<1x8x8xf32>
    "tpu.trace_stop"() : () -> ()
    %cst_7 = arith.constant dense<0xFF800000> : vector<1x8xf32>
    %25 = vector.multi_reduction <maximumf>, %24, %cst_7 [2] : vector<1x8x8xf32> to vector<1x8xf32>
    %26 = vector.shape_cast %25 : vector<1x8xf32> to vector<1x8x1xf32>
    %27 = vector.broadcast %26 : vector<1x8x1xf32> to vector<1x8x8xf32>
    %28 = arith.subf %24, %27 : vector<1x8x8xf32>
    %29 = math.exp %28 : vector<1x8x8xf32>
    %cst_8 = arith.constant dense<0.000000e+00> : vector<1x8xf32>
    %30 = vector.multi_reduction <add>, %29, %cst_8 [2] : vector<1x8x8xf32> to vector<1x8xf32>
    %31 = vector.shape_cast %30 : vector<1x8xf32> to vector<1x8x1xf32>
    %32 = tpu.reciprocal %31 {approx = true} : vector<1x8x1xf32> -> vector<1x8x1xf32>
    %33 = vector.broadcast %32 : vector<1x8x1xf32> to vector<1x8x8xf32>
    %34 = arith.mulf %29, %33 : vector<1x8x8xf32>
    %35 = vector.shape_cast %34 : vector<1x8x8xf32> to vector<1x1x8x8xf32>
    %c0_9 = arith.constant 0 : index
    %c0_10 = arith.constant 0 : index
    %c0_11 = arith.constant 0 : index
    %c0_12 = arith.constant 0 : index
    %36 = vector.load %arg6[%c0_9, %c0_10, %c0_11, %c0_12] : memref<1x4x8x8xf32, #tpu.memory_space<vmem>>, vector<1x1x8x8xf32>
    tpu.vector_store %arg6[%c0_9, %c0_10, %c0_11, %c0_12], %35 {strides = array<i32>} : memref<1x4x8x8xf32, #tpu.memory_space<vmem>>, vector<1x1x8x8xf32>,
    "tpu.trace_start"() <{level = 10 : i32, message = "bqk,bkd->bqd"}> : () -> ()
    %cst_13 = arith.constant dense<0.000000e+00> : vector<1x8x8xf32>
    %37 = tpu.matmul %34, %23, %cst_13 {dimension_numbers = #tpu.dot_dimension_numbers<[2], [1], [1], [2], [0, 0, 0, 1, 1, 2], [0], [0]>} : vector<1x8x8xf32>, vector<1x8x8xf32>, vector<1x8x8xf32> -> vector<1x8x8xf32>
    "tpu.trace_stop"() : () -> ()
    %38 = vector.shape_cast %37 : vector<1x8x8xf32> to vector<8x8xf32>
    %39 = vector.extract_strided_slice %17 {offsets = [0, 8], sizes = [8, 8], strides = [1, 1]} : vector<8x96xf32> to vector<8x8xf32>
    %40 = vector.shape_cast %39 : vector<8x8xf32> to vector<1x8x8xf32>
    %41 = vector.extract_strided_slice %17 {offsets = [0, 40], sizes = [8, 8], strides = [1, 1]} : vector<8x96xf32> to vector<8x8xf32>
    %42 = vector.shape_cast %41 : vector<8x8xf32> to vector<1x8x8xf32>
    %43 = vector.extract_strided_slice %17 {offsets = [0, 72], sizes = [8, 8], strides = [1, 1]} : vector<8x96xf32> to vector<8x8xf32>
    %44 = vector.shape_cast %43 : vector<8x8xf32> to vector<1x8x8xf32>
    "tpu.trace_start"() <{level = 10 : i32, message = "bqd,bkd->bqk"}> : () -> ()
    %cst_14 = arith.constant dense<0.000000e+00> : vector<1x8x8xf32>
    %45 = tpu.matmul %40, %42, %cst_14 {dimension_numbers = #tpu.dot_dimension_numbers<[2], [2], [1], [1], [0, 0, 0, 1, 1, 1], [0], [0]>} : vector<1x8x8xf32>, vector<1x8x8xf32>, vector<1x8x8xf32> -> vector<1x8x8xf32>
    "tpu.trace_stop"() : () -> ()
    %cst_15 = arith.constant dense<0xFF800000> : vector<1x8xf32>
    %46 = vector.multi_reduction <maximumf>, %45, %cst_15 [2] : vector<1x8x8xf32> to vector<1x8xf32>
    %47 = vector.shape_cast %46 : vector<1x8xf32> to vector<1x8x1xf32>
    %48 = vector.broadcast %47 : vector<1x8x1xf32> to vector<1x8x8xf32>
    %49 = arith.subf %45, %48 : vector<1x8x8xf32>
    %50 = math.exp %49 : vector<1x8x8xf32>
    %cst_16 = arith.constant dense<0.000000e+00> : vector<1x8xf32>
    %51 = vector.multi_reduction <add>, %50, %cst_16 [2] : vector<1x8x8xf32> to vector<1x8xf32>
    %52 = vector.shape_cast %51 : vector<1x8xf32> to vector<1x8x1xf32>
    %53 = tpu.reciprocal %52 {approx = true} : vector<1x8x1xf32> -> vector<1x8x1xf32>
    %54 = vector.broadcast %53 : vector<1x8x1xf32> to vector<1x8x8xf32>
    %55 = arith.mulf %50, %54 : vector<1x8x8xf32>
    %56 = vector.shape_cast %55 : vector<1x8x8xf32> to vector<1x1x8x8xf32>
    %c0_17 = arith.constant 0 : index
    %c1 = arith.constant 1 : index
    %c0_18 = arith.constant 0 : index
    %c0_19 = arith.constant 0 : index
    %57 = vector.load %arg6[%c0_17, %c1, %c0_18, %c0_19] : memref<1x4x8x8xf32, #tpu.memory_space<vmem>>, vector<1x1x8x8xf32>
    tpu.vector_store %arg6[%c0_17, %c1, %c0_18, %c0_19], %56 {strides = array<i32>} : memref<1x4x8x8xf32, #tpu.memory_space<vmem>>, vector<1x1x8x8xf32>,
    "tpu.trace_start"() <{level = 10 : i32, message = "bqk,bkd->bqd"}> : () -> ()
    %cst_20 = arith.constant dense<0.000000e+00> : vector<1x8x8xf32>
    %58 = tpu.matmul %55, %44, %cst_20 {dimension_numbers = #tpu.dot_dimension_numbers<[2], [1], [1], [2], [0, 0, 0, 1, 1, 2], [0], [0]>} : vector<1x8x8xf32>, vector<1x8x8xf32>, vector<1x8x8xf32> -> vector<1x8x8xf32>
    "tpu.trace_stop"() : () -> ()
    %59 = vector.shape_cast %58 : vector<1x8x8xf32> to vector<8x8xf32>
    %60 = vector.extract_strided_slice %17 {offsets = [0, 16], sizes = [8, 8], strides = [1, 1]} : vector<8x96xf32> to vector<8x8xf32>
    %61 = vector.shape_cast %60 : vector<8x8xf32> to vector<1x8x8xf32>
    %62 = vector.extract_strided_slice %17 {offsets = [0, 48], sizes = [8, 8], strides = [1, 1]} : vector<8x96xf32> to vector<8x8xf32>
    %63 = vector.shape_cast %62 : vector<8x8xf32> to vector<1x8x8xf32>
    %64 = vector.extract_strided_slice %17 {offsets = [0, 80], sizes = [8, 8], strides = [1, 1]} : vector<8x96xf32> to vector<8x8xf32>
    %65 = vector.shape_cast %64 : vector<8x8xf32> to vector<1x8x8xf32>
    "tpu.trace_start"() <{level = 10 : i32, message = "bqd,bkd->bqk"}> : () -> ()
    %cst_21 = arith.constant dense<0.000000e+00> : vector<1x8x8xf32>
    %66 = tpu.matmul %61, %63, %cst_21 {dimension_numbers = #tpu.dot_dimension_numbers<[2], [2], [1], [1], [0, 0, 0, 1, 1, 1], [0], [0]>} : vector<1x8x8xf32>, vector<1x8x8xf32>, vector<1x8x8xf32> -> vector<1x8x8xf32>
    "tpu.trace_stop"() : () -> ()
    %cst_22 = arith.constant dense<0xFF800000> : vector<1x8xf32>
    %67 = vector.multi_reduction <maximumf>, %66, %cst_22 [2] : vector<1x8x8xf32> to vector<1x8xf32>
    %68 = vector.shape_cast %67 : vector<1x8xf32> to vector<1x8x1xf32>
    %69 = vector.broadcast %68 : vector<1x8x1xf32> to vector<1x8x8xf32>
    %70 = arith.subf %66, %69 : vector<1x8x8xf32>
    %71 = math.exp %70 : vector<1x8x8xf32>
    %cst_23 = arith.constant dense<0.000000e+00> : vector<1x8xf32>
    %72 = vector.multi_reduction <add>, %71, %cst_23 [2] : vector<1x8x8xf32> to vector<1x8xf32>
    %73 = vector.shape_cast %72 : vector<1x8xf32> to vector<1x8x1xf32>
    %74 = tpu.reciprocal %73 {approx = true} : vector<1x8x1xf32> -> vector<1x8x1xf32>
    %75 = vector.broadcast %74 : vector<1x8x1xf32> to vector<1x8x8xf32>
    %76 = arith.mulf %71, %75 : vector<1x8x8xf32>
    %77 = vector.shape_cast %76 : vector<1x8x8xf32> to vector<1x1x8x8xf32>
    %c0_24 = arith.constant 0 : index
    %c2 = arith.constant 2 : index
    %c0_25 = arith.constant 0 : index
    %c0_26 = arith.constant 0 : index
    %78 = vector.load %arg6[%c0_24, %c2, %c0_25, %c0_26] : memref<1x4x8x8xf32, #tpu.memory_space<vmem>>, vector<1x1x8x8xf32>
    tpu.vector_store %arg6[%c0_24, %c2, %c0_25, %c0_26], %77 {strides = array<i32>} : memref<1x4x8x8xf32, #tpu.memory_space<vmem>>, vector<1x1x8x8xf32>,
    "tpu.trace_start"() <{level = 10 : i32, message = "bqk,bkd->bqd"}> : () -> ()
    %cst_27 = arith.constant dense<0.000000e+00> : vector<1x8x8xf32>
    %79 = tpu.matmul %76, %65, %cst_27 {dimension_numbers = #tpu.dot_dimension_numbers<[2], [1], [1], [2], [0, 0, 0, 1, 1, 2], [0], [0]>} : vector<1x8x8xf32>, vector<1x8x8xf32>, vector<1x8x8xf32> -> vector<1x8x8xf32>
    "tpu.trace_stop"() : () -> ()
    %80 = vector.shape_cast %79 : vector<1x8x8xf32> to vector<8x8xf32>
    %81 = vector.extract_strided_slice %17 {offsets = [0, 24], sizes = [8, 8], strides = [1, 1]} : vector<8x96xf32> to vector<8x8xf32>
    %82 = vector.shape_cast %81 : vector<8x8xf32> to vector<1x8x8xf32>
    %83 = vector.extract_strided_slice %17 {offsets = [0, 56], sizes = [8, 8], strides = [1, 1]} : vector<8x96xf32> to vector<8x8xf32>
    %84 = vector.shape_cast %83 : vector<8x8xf32> to vector<1x8x8xf32>
    %85 = vector.extract_strided_slice %17 {offsets = [0, 88], sizes = [8, 8], strides = [1, 1]} : vector<8x96xf32> to vector<8x8xf32>
    %86 = vector.shape_cast %85 : vector<8x8xf32> to vector<1x8x8xf32>
    "tpu.trace_start"() <{level = 10 : i32, message = "bqd,bkd->bqk"}> : () -> ()
    %cst_28 = arith.constant dense<0.000000e+00> : vector<1x8x8xf32>
    %87 = tpu.matmul %82, %84, %cst_28 {dimension_numbers = #tpu.dot_dimension_numbers<[2], [2], [1], [1], [0, 0, 0, 1, 1, 1], [0], [0]>} : vector<1x8x8xf32>, vector<1x8x8xf32>, vector<1x8x8xf32> -> vector<1x8x8xf32>
    "tpu.trace_stop"() : () -> ()
    %cst_29 = arith.constant dense<0xFF800000> : vector<1x8xf32>
    %88 = vector.multi_reduction <maximumf>, %87, %cst_29 [2] : vector<1x8x8xf32> to vector<1x8xf32>
    %89 = vector.shape_cast %88 : vector<1x8xf32> to vector<1x8x1xf32>
    %90 = vector.broadcast %89 : vector<1x8x1xf32> to vector<1x8x8xf32>
    %91 = arith.subf %87, %90 : vector<1x8x8xf32>
    %92 = math.exp %91 : vector<1x8x8xf32>
    %cst_30 = arith.constant dense<0.000000e+00> : vector<1x8xf32>
    %93 = vector.multi_reduction <add>, %92, %cst_30 [2] : vector<1x8x8xf32> to vector<1x8xf32>
    %94 = vector.shape_cast %93 : vector<1x8xf32> to vector<1x8x1xf32>
    %95 = tpu.reciprocal %94 {approx = true} : vector<1x8x1xf32> -> vector<1x8x1xf32>
    %96 = vector.broadcast %95 : vector<1x8x1xf32> to vector<1x8x8xf32>
    %97 = arith.mulf %92, %96 : vector<1x8x8xf32>
    %98 = vector.shape_cast %97 : vector<1x8x8xf32> to vector<1x1x8x8xf32>
    %c0_31 = arith.constant 0 : index
    %c3 = arith.constant 3 : index
    %c0_32 = arith.constant 0 : index
    %c0_33 = arith.constant 0 : index
    %99 = vector.load %arg6[%c0_31, %c3, %c0_32, %c0_33] : memref<1x4x8x8xf32, #tpu.memory_space<vmem>>, vector<1x1x8x8xf32>
    tpu.vector_store %arg6[%c0_31, %c3, %c0_32, %c0_33], %98 {strides = array<i32>} : memref<1x4x8x8xf32, #tpu.memory_space<vmem>>, vector<1x1x8x8xf32>,
    "tpu.trace_start"() <{level = 10 : i32, message = "bqk,bkd->bqd"}> : () -> ()
    %cst_34 = arith.constant dense<0.000000e+00> : vector<1x8x8xf32>
    %100 = tpu.matmul %97, %86, %cst_34 {dimension_numbers = #tpu.dot_dimension_numbers<[2], [1], [1], [2], [0, 0, 0, 1, 1, 2], [0], [0]>} : vector<1x8x8xf32>, vector<1x8x8xf32>, vector<1x8x8xf32> -> vector<1x8x8xf32>
    "tpu.trace_stop"() : () -> ()
    %101 = vector.shape_cast %100 : vector<1x8x8xf32> to vector<8x8xf32>
    %102 = tpu.concatenate %38, %59, %80, %101 in 1 : vector<8x8xf32>, vector<8x8xf32>, vector<8x8xf32>, vector<8x8xf32> -> vector<8x32xf32>
    %cst_35 = arith.constant dense<0.000000e+00> : vector<8x32xf32>
    %103 = tpu.matmul %102, %5, %cst_35 {dimension_numbers = #tpu.dot_dimension_numbers<[1], [0], [0], [1], [0, 0, 1, 1], [], []>} : vector<8x32xf32>, vector<32x32xf32>, vector<8x32xf32> -> vector<8x32xf32>
    %104 = vector.broadcast %9 : vector<1x32xf32> to vector<8x32xf32>
    %105 = arith.addf %103, %104 : vector<8x32xf32>
    %106 = arith.addf %105, %1 : vector<8x32xf32>
    %cst_36 = arith.constant dense<0.000000e+00> : vector<8xf32>
    %107 = vector.multi_reduction <add>, %106, %cst_36 [1] : vector<8x32xf32> to vector<8xf32>
    %108 = vector.shape_cast %107 : vector<8xf32> to vector<8x1xf32>
    %cst_37 = arith.constant 3.200000e+01 : f32
    %109 = vector.broadcast %cst_37 : f32 to vector<8x1xf32>
    %110 = arith.divf %108, %109 : vector<8x1xf32>
    %111 = vector.broadcast %110 : vector<8x1xf32> to vector<8x32xf32>
    %112 = arith.subf %106, %111 : vector<8x32xf32>
    %113 = arith.mulf %112, %112 : vector<8x32xf32>
    %cst_38 = arith.constant dense<0.000000e+00> : vector<8xf32>
    %114 = vector.multi_reduction <add>, %113, %cst_38 [1] : vector<8x32xf32> to vector<8xf32>
    %115 = vector.shape_cast %114 : vector<8xf32> to vector<8x1xf32>
    %cst_39 = arith.constant 3.200000e+01 : f32
    %116 = vector.broadcast %cst_39 : f32 to vector<8x1xf32>
    %117 = arith.divf %115, %116 : vector<8x1xf32>
    %118 = vector.broadcast %110 : vector<8x1xf32> to vector<8x32xf32>
    %119 = arith.subf %106, %118 : vector<8x32xf32>
    %cst_40 = arith.constant 9.99999997E-7 : f32
    %120 = vector.broadcast %cst_40 : f32 to vector<8x1xf32>
    %121 = arith.addf %117, %120 : vector<8x1xf32>
    %122 = math.rsqrt %121 : vector<8x1xf32>
    %123 = vector.broadcast %122 : vector<8x1xf32> to vector<8x32xf32>
    %124 = arith.mulf %119, %123 : vector<8x32xf32>
    %125 = vector.broadcast %11 : vector<1x32xf32> to vector<8x32xf32>
    %126 = arith.mulf %124, %125 : vector<8x32xf32>
    %127 = vector.broadcast %12 : vector<1x32xf32> to vector<8x32xf32>
    %128 = arith.addf %126, %127 : vector<8x32xf32>
    %cst_41 = arith.constant dense<0.000000e+00> : vector<8x64xf32>
    %129 = tpu.matmul %128, %4, %cst_41 {dimension_numbers = #tpu.dot_dimension_numbers<[1], [0], [0], [1], [0, 0, 1, 1], [], []>} : vector<8x32xf32>, vector<32x64xf32>, vector<8x64xf32> -> vector<8x64xf32>
    %130 = vector.broadcast %8 : vector<1x64xf32> to vector<8x64xf32>
    %131 = arith.addf %129, %130 : vector<8x64xf32>
    %cst_42 = arith.constant 0.000000e+00 : f32
    %132 = vector.broadcast %cst_42 : f32 to vector<8x64xf32>
    %133 = arith.maximumf %131, %132 : vector<8x64xf32>
    %c0_43 = arith.constant 0 : index
    %c0_44 = arith.constant 0 : index
    %134 = vector.load %arg3[%c0_43, %c0_44] : memref<64x32xf32, #tpu.memory_space<vmem>>, vector<64x32xf32>
    %cst_45 = arith.constant dense<0.000000e+00> : vector<8x32xf32>
    %135 = tpu.matmul %133, %134, %cst_45 {dimension_numbers = #tpu.dot_dimension_numbers<[1], [0], [0], [1], [0, 0, 1, 1], [], []>} : vector<8x64xf32>, vector<64x32xf32>, vector<8x32xf32> -> vector<8x32xf32>
    %136 = vector.broadcast %10 : vector<1x32xf32> to vector<8x32xf32>
    %137 = arith.addf %135, %136 : vector<8x32xf32>
    %138 = arith.addf %137, %128 : vector<8x32xf32>
    %cst_46 = arith.constant dense<0.000000e+00> : vector<8xf32>
    %139 = vector.multi_reduction <add>, %138, %cst_46 [1] : vector<8x32xf32> to vector<8xf32>
    %140 = vector.shape_cast %139 : vector<8xf32> to vector<8x1xf32>
    %cst_47 = arith.constant 3.200000e+01 : f32
    %141 = vector.broadcast %cst_47 : f32 to vector<8x1xf32>
    %142 = arith.divf %140, %141 : vector<8x1xf32>
    %143 = vector.broadcast %142 : vector<8x1xf32> to vector<8x32xf32>
    %144 = arith.subf %138, %143 : vector<8x32xf32>
    %145 = arith.mulf %144, %144 : vector<8x32xf32>
    %cst_48 = arith.constant dense<0.000000e+00> : vector<8xf32>
    %146 = vector.multi_reduction <add>, %145, %cst_48 [1] : vector<8x32xf32> to vector<8xf32>
    %147 = vector.shape_cast %146 : vector<8xf32> to vector<8x1xf32>
    %cst_49 = arith.constant 3.200000e+01 : f32
    %148 = vector.broadcast %cst_49 : f32 to vector<8x1xf32>
    %149 = arith.divf %147, %148 : vector<8x1xf32>
    %150 = vector.broadcast %142 : vector<8x1xf32> to vector<8x32xf32>
    %151 = arith.subf %138, %150 : vector<8x32xf32>
    %cst_50 = arith.constant 9.99999997E-7 : f32
    %152 = vector.broadcast %cst_50 : f32 to vector<8x1xf32>
    %153 = arith.addf %149, %152 : vector<8x1xf32>
    %154 = math.rsqrt %153 : vector<8x1xf32>
    %155 = vector.broadcast %154 : vector<8x1xf32> to vector<8x32xf32>
    %156 = arith.mulf %151, %155 : vector<8x32xf32>
    %157 = vector.broadcast %13 : vector<1x32xf32> to vector<8x32xf32>
    %158 = arith.mulf %156, %157 : vector<8x32xf32>
    %159 = vector.broadcast %14 : vector<1x32xf32> to vector<8x32xf32>
    %160 = arith.addf %158, %159 : vector<8x32xf32>
    %161 = vector.shape_cast %160 : vector<8x32xf32> to vector<1x8x32xf32>
    %c0_51 = arith.constant 0 : index
    %c0_52 = arith.constant 0 : index
    %c0_53 = arith.constant 0 : index
    %162 = vector.load %arg5[%c0_51, %c0_52, %c0_53] : memref<1x8x32xf32, #tpu.memory_space<vmem>>, vector<1x8x32xf32>
    tpu.vector_store %arg5[%c0_51, %c0_52, %c0_53], %161 {strides = array<i32>} : memref<1x8x32xf32, #tpu.memory_space<vmem>>, vector<1x8x32xf32>,
    return
  }
  func.func @transform_0(%arg0: i32) -> (i32, i32, i32) {
    %c0_i32 = arith.constant 0 : i32
    %c0_i32_0 = arith.constant 0 : i32
    %c0_i32_1 = arith.constant 0 : i32
    return %arg0, %c0_i32, %c0_i32_0 : i32, i32, i32
  }
  func.func @transform_1(%arg0: i32) -> (i32, i32) {
    %c0_i32 = arith.constant 0 : i32
    %c0_i32_0 = arith.constant 0 : i32
    %c0_i32_1 = arith.constant 0 : i32
    return %c0_i32, %c0_i32_0 : i32, i32
  }
  func.func @transform_2(%arg0: i32) -> (i32, i32) {
    %c0_i32 = arith.constant 0 : i32
    %c0_i32_0 = arith.constant 0 : i32
    %c0_i32_1 = arith.constant 0 : i32
    return %c0_i32, %c0_i32_0 : i32, i32
  }
  func.func @transform_3(%arg0: i32) -> (i32, i32) {
    %c0_i32 = arith.constant 0 : i32
    %c0_i32_0 = arith.constant 0 : i32
    %c0_i32_1 = arith.constant 0 : i32
    return %c0_i32, %c0_i32_0 : i32, i32
  }
  func.func @transform_4(%arg0: i32) -> (i32, i32, i32) {
    %c0_i32 = arith.constant 0 : i32
    %c0_i32_0 = arith.constant 0 : i32
    %c0_i32_1 = arith.constant 0 : i32
    return %arg0, %c0_i32, %c0_i32_0 : i32, i32, i32
  }
  func.func @transform_5(%arg0: i32) -> (i32, i32, i32, i32) {
    %c0_i32 = arith.constant 0 : i32
    %c0_i32_0 = arith.constant 0 : i32
    %c0_i32_1 = arith.constant 0 : i32
    %c0_i32_2 = arith.constant 0 : i32
    return %arg0, %c0_i32, %c0_i32_0, %c0_i32_1 : i32, i32, i32, i32
  }
}

</mosaic_0001>

<bundles_post_ra>
// kernel: tpu_custom_call.1
= control target key start
LH: loop header
LB: loop body
LE: loop exit
PB: predicated region body
PF: predicated region fallthrough
CT: control target
= control target key end

     0   :  { %11 = vsyncpa [#allocation3], 0  ;;  %s1444_s0 = inlined_call_operand.vmem [shape: f32[2,8,32], index: 0, kind: input, shape index: {}]   ;;  %s1445_s1 = inlined_call_operand.vmem [shape: f32[32,192], index: 1, kind: input, shape index: {}]   ;;  %s1446_s2 = inlined_call_operand.vmem [shape: f32[64,32], index: 2, kind: input, shape index: {}]   ;;  %s1447_s3 = inlined_call_operand.vmem [shape: f32[8,128], index: 3, kind: input, shape index: {}]   ;;  %s1448_s4 = inlined_call_operand.hbm [shape: f32[2,8,32], index: 4, kind: output, shape index: {0}]   ;;  %s1449_s5 = inlined_call_operand.hbm [shape: f32[2,4,8,8], index: 5, kind: output, shape index: {1}]  }
   0x1   :  { %13 = vsyncpa [#allocation3 + $0x1], 0 }
   0x2   :  { %14 = vsyncpa [#allocation5], 0 }
   0x3   :  { %16 = vsyncpa [#allocation5 + $0x1], 0  ;;  %s1158_s18 = smov 0   ;;  %s1160_s19 = smov 0  }
   0x4   :  { %s1162_s20 = smov 0   ;;  %s1164_s21 = smov 0  }
   0x5 LB: > { %s1179_s22 = sadd.s32 4294967295, %s1109_s21   ;;  %s868_s23 = sadd.s32 4294967294, %s1109_s21   ;;  %s1109_s21 = sphi %s1164_s21, %s1457_s21   ;;  %s1105_s20 = sphi %s1162_s20, %s1456_s20   ;;  %s1101_s19 = sphi %s1160_s19, %s1455_s19   ;;  %s1097_s18 = sphi %s1158_s18, %s1454_s18  }
   0x6   : > { %s1183_s24 = sadd.s32 1, %s1109_s21   ;;  %s118_s25 = sadd.s32 1, %s1105_s20 }
   0x7   : > { %s115_s26 = ssub.s32 %s1109_s21, %s1183_s24  ;;  %p128_p0 = scmp.ne.s32.totalorder %s1105_s20, %s1101_s19 }
   0x8   : > { %p116_p1 = scmp.eq.s32.totalorder %s115_s26, 0  ;;  %p129_p2 = scmp.eq.s32.totalorder %s1179_s22, 1 }
   0x9   : > { %p134_p3 = scmp.ne.s32.totalorder %s1101_s19, %s1097_s18  ;;  %p135_p4 = scmp.eq.s32.totalorder %s868_s23, 1 }
   0xa   : > { %s1194_s27 = scalar_select %p116_p1, %s1105_s20, %s118_s25  }
   0xb   : > { %p1196_p5 = por %p129_p2, %p128_p0  ;;  %p1200_p6 = por %p135_p4, %p134_p3 }
   0xc   : > { %p871_p7 = scmp.ge.s32.totalorder %s1109_s21, 1  ;;  %p195_p8 = scmp.lt.s32.totalorder %s1109_s21, 3 }
   0xe   : > { %p196_p9 = pnand %p871_p7, %p195_p8 }
   0xf   : > { %p227_p10 = scmp.lt.s32.totalorder (!%p196_p9), %s1179_s22, 1  ;;  %s1111_s12 = smov (!%p196_p9), 64  }
  0x10   : > { %199 = sbr.rel (%p196_p9) target bundleno = 2248 (0x8c8), region = 36  ;;  %s1112_s13 = smov (!%p196_p9), 120  }
  0x11   : > { %s1113_s14 = smov (!%p196_p9), 96   ;;  %s1114_s15 = smov (!%p196_p9), 56  }
  0x12   : > { %s1115_s16 = smov (!%p196_p9), 88   ;;  %s1116_s17 = smov (!%p196_p9), 104  }
  0x13   : > { %s1117_s23 = smov (!%p196_p9), 72   ;;  %s1118_s25 = smov (!%p196_p9), 80  }
  0x14   : > { %s1119_s26 = smov (!%p196_p9), 112   ;;  %s1120_s8 = smov (!%p196_p9), 40  }
  0x15   : > { %v1209_v0 = vld [vmem:[%s1445_s1 + $0x30] sm:$0xff]  ;;  %v1214_v1 = vld [vmem:[%s1445_s1 + $0x38] sm:$0xff]  ;;  %v1219_v2 = vld [vmem:[%s1445_s1 + $0x28] sm:$0xff]  ;;  %s228_s30 = scalar_select %p227_p10, %s1179_s22, 1  ;;  %vm242_vm0 = vcmask 261120   ;;  %vm269_vm1 = vcmask 64512  }
  0x16   : > { %v973_v3 = vpack.i.bf16 %v1214_v1, %v1209_v0  ;;  %258 = vmatpush.msra.mxu0 %v1209_v0  ;;  %v1228_v4 = vld [vmem:[%s1445_s1 + $0x20] sm:$0xff]  ;;  %v1233_v5 = vld [vmem:[%s1445_s1 + $0x10] sm:$0xff]  ;;  %v1238_v6 = vld [vmem:[%s1445_s1 + $0x18] sm:$0xff]  ;;  %v963_v63 = vpack.i.bf16 %v1219_v2, %v1214_v1  ;;  %s1450_s10 = smov 8   ;;  %s1123_s11 = smov 24   ;;  %vm546_vm2 = vcmask 130048  }
  0x17   : > { %v978_v7 = vpack.i.bf16 %v1219_v2, %v1228_v4  ;;  %v983_v8 = vpack.i.bf16 %v1238_v6, %v1233_v5  ;;  %v1247_v9 = vld [vmem:[%s1445_s1 + $0x8] sm:$0xff]  ;;  %v1252_v10 = vld [vmem:[%s1445_s1] sm:$0xff]  ;;  %s874_s6 = sshll.u32 %s228_s30, 3  ;;  %s1295_s30 = sand.u32 1, %s1101_s19   ;;  %vm548_vm3 = vcmask 195584   ;;  %vm686_vm8 = vcmask 523264  }
  0x18   : > { %259 = vmatpush.msra.mxu0 %v1228_v4  ;;  %v988_v11 = vpack.i.bf16 %v1247_v9, %v1252_v10  ;;  %s230_s9 = scalar_lea.vmem %s1444_s0, %s874_s6  ;;  %v1270_v13 = vld [vmem:[%s1447_s3] sm:$0xff]  ;;  %s873_s6 = sshll.u32 %s1295_s30, 5 }
  0x19   : > { %v1262_v12 = vld [vmem:[%s230_s9] sm:$0xff]  ;;  %v241_v14 = vperm.slane %v1270_v13, 0  ;;  %s1300_s7 = scalar_lea.vmem [#allocation4], %s873_s6  ;;  %s1121_s9 = smov 48  }
  0x1a   : > { %260 = vmatpush.msra.mxu0 %v1233_v5  ;;  %s770_s6 = sshll.u32 %s1300_s7, 4  ;;  %s771_s6 = int_to_ptr.vmem [resolvable:$true] %s770_s6 }
  0x1c   : > { %261 = vmatpush.msra.mxu0 %v1252_v10 }
  0x1d   : > { %875 = vmatmul.msk.f32.vlgmr.msra.gmra.mxu0 %vm242_vm0, %v1262_v12 }
  0x9a   : > { %v263_v15 = vpop.f32.mrf.mxu0 }
  0x9b   : > { %v1273_v16 = vadd.f32 %v263_v15, %v241_v14  ;;  %v968_v14 = vpack.i.bf16 %v1247_v9, %v1238_v6 }
  0x9d   : > { %306 = vrot.lane.b32.xlu2 %v1273_v16, %s1111_s12  ;;  %332 = vrot.lane.b32.xlu1 %v1273_v16, %s1112_s13  ;;  %s1124_s12 = smov 16   ;;  %s1125_s13 = smov 32  }
  0x9e   : > { %267 = vrot.lane.b32.xlu0 %v1273_v16, %s1113_s14 }
  0xa5   : > { %373 = vrot.lane.b32.xlu2 %v1273_v16, %s1114_s15  ;;  %s1035_s15 = scalar_lea.hbm %s1449_s5, 64 }
  0xa6   : > { %334 = vrot.lane.b32.xlu0 %v1273_v16, %s1115_s16 }
  0xf7   : > { %v307_v17 = vpop.permute.xlu2 %306 }
  0xf8   : > { %327 = vmatpush.msra.mxu2 %v307_v17 }
  0xff   : > { %v374_v18 = vpop.permute.xlu2 %373 }
 0x100   : > { %394 = vmatpush.msrb.mxu2 %v374_v18 }
 0x10f   : > { %v333_v21 = vpop.permute.xlu1 %332 }
 0x110   : > { %v268_v19 = vpop.permute.xlu0 %267 }
 0x111   : > { %876 = vmatpush.xpose.msk.msra.mxu1 %vm269_vm1, %v268_v19 }
 0x114   : > { %877 = vmatmul.msk.f32.vlgmr.msra.gmra.mxu1 %vm269_vm1, %v1273_v16 }
 0x118   : > { %v335_v20 = vpop.permute.xlu0 %334 }
 0x119   : > { %879 = vmatpush.xpose.msk.msra.mxu3 %vm269_vm1, %v335_v20 }
 0x11c   : > { %880 = vmatmul.msk.f32.vlgmr.msra.gmra.mxu3 %vm269_vm1, %v333_v21 }
 0x191   : > { %v291_v22 = vpop.f32.mrf.mxu1 }
 0x192   : > { %v294_v23 = vsel %vm269_vm1, %v291_v22, -inf }
 0x193   : > { %295 = vmax.xlane.f32.xlu1 %v294_v23 }
 0x19f   : > { %v357_v24 = vpop.f32.mrf.mxu3 }
 0x1a0   : > { %v360_v25 = vsel %vm269_vm1, %v357_v24, -inf }
 0x1a1   : > { %361 = vmax.xlane.f32.xlu2 %v360_v25 }
 0x1ac   : > { %466 = vrot.lane.b32.xlu1 %v1273_v16, %s1116_s17  ;;  %s901_s17 = sshll.u32 %s1179_s22, 5 }
 0x1b9   : > { %468 = vrot.lane.b32.xlu2 %v1273_v16, %s1117_s23 }
 0x206   : > { %v296_v26 = vpop.xlane.xlu1 %295 }
 0x207   : > { %v297_v27 = vsub.f32 %v291_v22, %v296_v26 }
 0x209   : > { %v298_v28 = vmul.f32 1.442695, %v297_v27 }
 0x20b   : > { %993 = vpow2.f32 %v298_v28 }
 0x211   : > { %v994_v29 = vpop.eup %993 }
 0x212   : > { %v300_v30 = vsel %vm269_vm1, %v994_v29, 0.0 }
 0x213   : > { %301 = vadd.xlane.f32.xlu2 %v300_v30 }
 0x214   : > { %v362_v31 = vpop.xlane.xlu2 %361 }
 0x215   : > { %v363_v32 = vsub.f32 %v357_v24, %v362_v31 }
 0x217   : > { %v364_v33 = vmul.f32 1.442695, %v363_v32 }
 0x219   : > { %995 = vpow2.f32 %v364_v33 }
 0x21c   : > { %v469_v36 = vpop.permute.xlu2 %468 }
 0x21e   : > { %v467_v44 = vpop.permute.xlu1 %466 }
 0x21f   : > { %v996_v34 = vpop.eup %995 }
 0x220   : > { %v366_v35 = vsel %vm269_vm1, %v996_v34, 0.0 }
 0x221   : > { %367 = vadd.xlane.f32.xlu0 %v366_v35 }
 0x22b   : > { %401 = vrot.lane.b32.xlu2 %v1273_v16, %s1118_s25 }
 0x235   : > { %399 = vrot.lane.b32.xlu0 %v1273_v16, %s1119_s26  ;;  %s769_s26 = scalar_lea.hbm %s1449_s5, %s901_s17 }
 0x286   : > { %v302_v37 = vpop.xlane.xlu2 %301 }
 0x287   : > { %997 = vrcp.f32 %v302_v37 }
 0x28d   : > { %v998_v38 = vpop.eup %997 }
 0x28e   : > { %v402_v39 = vpop.permute.xlu2 %401  ;;  %v304_v40 = vmul.f32 %v998_v38, %v994_v29 }
 0x28f   : > { %883 = vmatpush.xpose.msk.msrb.mxu1 %vm269_vm1, %v402_v39 }
 0x290   : > { %878 = vmatmul.msk.f32.vlgmr.msra.gmra.mxu2 %vm269_vm1, %v304_v40  ;;  %305 = vst.msk [vmem:[%s1300_s7] sm:$0xff] %vm269_vm1, %v304_v40 }
 0x291   : > { %887 = vmatpush.xpose.msk.msra.mxu2 %vm269_vm1, %v469_v36  ;;  %v550_v36 = vperm.slane %v1270_v13, 2 }
 0x294   : > { %v368_v41 = vpop.xlane.xlu0 %367 }
 0x295   : > { %999 = vrcp.f32 %v368_v41  ;;  %v1126_v41 = vmov 32.0  }
 0x29b   : > { %v1000_v42 = vpop.eup %999 }
 0x29c   : > { %v370_v43 = vmul.f32 %v1000_v42, %v996_v34 }
 0x29e   : > { %882 = vmatmul.msk.f32.vlgmr.msrb.gmra.mxu2 %vm269_vm1, %v370_v43  ;;  %881 = vst.msk [vmem:[%s1300_s7 + $0x8] sm:$0xff] %vm269_vm1, %v370_v43 }
 0x2a6   : > { %888 = vmatmul.msk.f32.vlgmr.msra.gmra.mxu2 %vm269_vm1, %v467_v44 }
 0x2a7   : > { %v400_v45 = vpop.permute.xlu0 %399 }
 0x2a8   : > { %884 = vmatmul.msk.f32.vlgmr.msrb.gmra.mxu1 %vm269_vm1, %v400_v45 }
 0x313   : > { %v1310_v46 = vpop.f32.mrf.mxu2 }
 0x321   : > { %v396_v47 = vpop.f32.mrf.mxu2 }
 0x325   : > { %v424_v48 = vpop.f32.mrf.mxu1 }
 0x326   : > { %v427_v49 = vsel %vm269_vm1, %v424_v48, -inf }
 0x327   : > { %428 = vmax.xlane.f32.xlu2 %v427_v49 }
 0x329   : > { %v491_v50 = vpop.f32.mrf.mxu2 }
 0x32a   : > { %v494_v51 = vsel %vm269_vm1, %v491_v50, -inf }
 0x32b   : > { %495 = vmax.xlane.f32.xlu1 %v494_v51 }
 0x344   : > { %507 = vrot.lane.b32.xlu1 %v1273_v16, %s1120_s8  ;;  %s772_s8 = sshll.u32 %s769_s26, 4  ;;  %s773_s8 = int_to_ptr.hbm [resolvable:$true] %s772_s8 }
 0x39a   : > { %v429_v52 = vpop.xlane.xlu2 %428 }
 0x39b   : > { %v430_v53 = vsub.f32 %v424_v48, %v429_v52 }
 0x39d   : > { %v431_v54 = vmul.f32 1.442695, %v430_v53 }
 0x39e   : > { %v496_v55 = vpop.xlane.xlu1 %495 }
 0x39f   : > { %1001 = vpow2.f32 %v431_v54  ;;  %v497_v56 = vsub.f32 %v491_v50, %v496_v55 }
 0x3a1   : > { %v498_v57 = vmul.f32 1.442695, %v497_v56  ;;  %v684_v56 = vld [vmem:[%s1446_s2 + $0x38] sm:$0xff] }
 0x3a2   : > { %698 = vmatpush.msrb.mxu0 %v684_v56 }
 0x3a3   : > { %1003 = vpow2.f32 %v498_v57  ;;  %v683_v57 = vld [vmem:[%s1446_s2 + $0x30] sm:$0xff] }
 0x3a4   : > { %699 = vmatpush.msrb.mxu0 %v683_v57 }
 0x3a5   : > { %v1002_v58 = vpop.eup %1001 }
 0x3a6   : > { %v433_v59 = vsel %vm269_vm1, %v1002_v58, 0.0 }
 0x3a7   : > { %434 = vadd.xlane.f32.xlu0 %v433_v59 }
 0x3a9   : > { %v1004_v60 = vpop.eup %1003 }
 0x3aa   : > { %v500_v61 = vsel %vm269_vm1, %v1004_v60, 0.0 }
 0x3ab   : > { %501 = vadd.xlane.f32.xlu2 %v500_v61  ;;  %v681_v61 = vld [vmem:[%s1446_s2 + $0x20] sm:$0xff] }
 0x3b6   : > { %v508_v62 = vpop.permute.xlu1 %507 }
 0x3b7   : > { %528 = vmatpush.msrb.mxu2 %v508_v62 }
 0x3bb   : > { %964 = vrot.lane.b32.xlu0 %v963_v63, %s1113_s14  ;;  %v680_v63 = vld [vmem:[%s1446_s2 + $0x18] sm:$0xff] }
 0x3c3   : > { %440 = vrot.lane.b32.xlu2 %v1273_v16, %s1121_s9  ;;  %969 = vrot.lane.b32.xlu0 %v968_v14, %s1113_s14  ;;  %s744_s9 = scalar_lea.sflag [#allocation5], %s1295_s30 }
 0x3cb   : > { %534 = vrot.lane.b32.xlu2 %v396_v47, %s1450_s10 }
 0x41a   : > { %v435_v15 = vpop.xlane.xlu0 %434 }
 0x41b   : > { %1005 = vrcp.f32 %v435_v15 }
 0x41e   : > { %v502_v17 = vpop.xlane.xlu2 %501 }
 0x41f   : > { %1007 = vrcp.f32 %v502_v17 }
 0x420   : > { %1009 = vrcp.f32 %v1126_v41 }
 0x421   : > { %v1006_v18 = vpop.eup %1005 }
 0x422   : > { %v437_v19 = vmul.f32 %v1006_v18, %v1002_v58  ;;  %v682_v58 = vld [vmem:[%s1446_s2 + $0x28] sm:$0xff] }
 0x423   : > { %700 = vmatpush.msrb.mxu0 %v682_v58 }
 0x424   : > { %885 = vst.msk [vmem:[%s1300_s7 + $0x10] sm:$0xff] %vm269_vm1, %v437_v19 }
 0x425   : > { %v1008_v20 = vpop.eup %1007  ;;  %701 = vmatpush.msrb.mxu0 %v681_v61 }
 0x426   : > { %v504_v21 = vmul.f32 %v1008_v20, %v1004_v60  ;;  %v441_v22 = vpop.permute.xlu2 %440  ;;  %v1010_v0 = vpop.eup %1009 }
 0x427   : > { %461 = vmatpush.msrb.mxu3 %v441_v22  ;;  %v595_v1 = vmul.f32 32.0, %v1010_v0  ;;  %vm599_vm4 = vweird.f32 %v1010_v0  ;;  %702 = vmatpush.msrb.mxu0 %v680_v63 }
 0x428   : > { %886 = vmatmul.msk.f32.vlgmr.msrb.gmra.mxu3 %vm269_vm1, %v437_v19  ;;  %890 = vmatmul.msk.f32.vlgmr.msrb.gmra.mxu2 %vm269_vm1, %v504_v21  ;;  %889 = vst.msk [vmem:[%s1300_s7 + $0x18] sm:$0xff] %vm269_vm1, %v504_v21  ;;  %v620_v21 = vperm.slane %v1270_v13, 4 }
 0x42d   : > { %v965_v24 = vpop.permute.xlu0 %964 }
 0x42e   : > { %v967_v25 = vunpack.i.h.bf16 %v965_v24  ;;  %v966_v26 = vunpack.i.l.bf16 %v965_v24  ;;  %v535_v30 = vpop.permute.xlu2 %534 }
 0x42f   : > { %v545_v31 = vsel %vm269_vm1, %v1310_v46, %v535_v30 }
 0x430   : > { %582 = vmatpush.msra.mxu1 %v966_v26  ;;  %v679_v26 = vld [vmem:[%s1446_s2 + $0x10] sm:$0xff] }
 0x431   : > { %703 = vmatpush.msrb.mxu0 %v679_v26 }
 0x432   : > { %583 = vmatpush.msra.mxu1 %v967_v25 }
 0x435   : > { %v970_v27 = vpop.permute.xlu0 %969 }
 0x436   : > { %v972_v28 = vunpack.i.h.bf16 %v970_v27  ;;  %v971_v29 = vunpack.i.l.bf16 %v970_v27  ;;  %v678_v27 = vld [vmem:[%s1446_s2 + $0x8] sm:$0xff] }
 0x437   : > { %704 = vmatpush.msrb.mxu0 %v678_v27 }
 0x438   : > { %584 = vmatpush.msra.mxu1 %v971_v29  ;;  %v624_v29 = vperm.slane %v1270_v13, 1 }
 0x43a   : > { %585 = vmatpush.msra.mxu1 %v972_v28  ;;  %v677_v28 = vld [vmem:[%s1446_s2] sm:$0xff] }
 0x43b   : > { %705 = vmatpush.msrb.mxu0 %v677_v28 }
 0x4ab   : > { %v463_v16 = vpop.f32.mrf.mxu3  ;;  %v530_v23 = vpop.f32.mrf.mxu2 }
 0x4ac   : > { %542 = vrot.lane.b32.xlu2 %v530_v23, %s1123_s11  ;;  %538 = vrot.lane.b32.xlu1 %v463_v16, %s1124_s12  ;;  %v622_v23 = vperm.slane %v1270_v13, 5  ;;  %s1029_s11 = sshra.s32 %s773_s8, 4  ;;  %s1030_s11 = int_to_ptr.hbm [resolvable:$true] %s1029_s11 }
 0x4ad   : > { %s1031_s12 = scalar_lea.hbm %s1030_s11, 32  ;;  %p1036_p0 = scmp.lt.s32.totalorder %s1030_s11, %s1449_s5 }
 0x4ae   : > { %p1032_p11 = scmp.ne.s32.totalorder %s1030_s11, %s1031_s12  ;;  %p1037_p1 = scmp.lt.s32.totalorder %s1035_s15, %s1031_s12 }
 0x4b0   : > { %p1033_p12 = pnand %p1032_p11, %p1196_p5  ;;  %p1038_p2 = por %p1037_p1, %p1036_p0 }
 0x4b2   : > { %p1034_p13 = pneg %p1033_p12 }
 0x4b4   : > { %974 = vrot.lane.b32.xlu2 %v973_v3, %s1125_s13  ;;  %v596_v3 = vsub.f32 1.0, %v595_v1  ;;  %p1039_p3 = pnand %p1038_p2, %p1034_p13 }
 0x4bc   : > { %979 = vrot.lane.b32.xlu2 %v978_v7, %s1125_s13 }
 0x4c4   : > { %984 = vrot.lane.b32.xlu2 %v983_v8, %s1125_s13 }
 0x4cc   : > { %989 = vrot.lane.b32.xlu2 %v988_v11, %s1125_s13 }
 0x506   : > { %v543_v33 = vpop.permute.xlu2 %542 }
 0x50e   : > { %v975_v8 = vpop.permute.xlu2 %974 }
 0x50f   : > { %v977_v9 = vunpack.i.h.bf16 %v975_v8  ;;  %v976_v10 = vunpack.i.l.bf16 %v975_v8 }
 0x511   : > { %v648_v11 = vsel %vm242_vm0, %v976_v10, %v977_v9 }
 0x512   : > { %668 = vmatpush.msra.mxu3 %v648_v11 }
 0x516   : > { %v980_v44 = vpop.permute.xlu2 %979 }
 0x517   : > { %v982_v45 = vunpack.i.h.bf16 %v980_v44  ;;  %v981_v46 = vunpack.i.l.bf16 %v980_v44 }
 0x519   : > { %v647_v47 = vsel %vm242_vm0, %v981_v46, %v982_v45 }
 0x51a   : > { %669 = vmatpush.msra.mxu3 %v647_v47 }
 0x51e   : > { %v539_v32 = vpop.permute.xlu1 %538  ;;  %v985_v48 = vpop.permute.xlu2 %984 }
 0x51f   : > { %v547_v34 = vsel %vm546_vm2, %v545_v31, %v539_v32  ;;  %v987_v49 = vunpack.i.h.bf16 %v985_v48  ;;  %v986_v50 = vunpack.i.l.bf16 %v985_v48 }
 0x520   : > { %v549_v35 = vsel %vm548_vm3, %v547_v34, %v543_v33  ;;  %v685_v33 = vperm.slane %v1270_v13, 3 }
 0x521   : > { %891 = vmatmul.msk.f32.vlgmr.msra.gmra.mxu1 %vm242_vm0, %v549_v35  ;;  %v646_v51 = vsel %vm242_vm0, %v986_v50, %v987_v49 }
 0x522   : > { %670 = vmatpush.msra.mxu3 %v646_v51 }
 0x526   : > { %v990_v52 = vpop.permute.xlu2 %989 }
 0x527   : > { %v992_v53 = vunpack.i.h.bf16 %v990_v52  ;;  %v991_v54 = vunpack.i.l.bf16 %v990_v52 }
 0x529   : > { %v645_v55 = vsel %vm242_vm0, %v991_v54, %v992_v53 }
 0x52a   : > { %671 = vmatpush.msra.mxu3 %v645_v55 }
 0x59e   : > { %v587_v37 = vpop.f32.mrf.mxu1 }
 0x59f   : > { %v588_v38 = vadd.f32 %v587_v37, %v550_v36 }
 0x5a1   : > { %v590_v39 = vadd.f32 %v588_v38, %v1262_v12  ;;  %v597_v12 = vmul.f32 %v1010_v0, %v596_v3 }
 0x5a3   : > { %v591_v40 = vsel %vm242_vm0, %v590_v39, 0.0  ;;  %v598_v42 = vadd.f32 %v1010_v0, %v597_v12 }
 0x5a4   : > { %592 = vadd.xlane.f32.xlu0 %v591_v40 }
 0x5a5   : > { %v1349_v43 = vsel %vm599_vm4, %v1010_v0, %v598_v42 }
 0x617   : > { %v593_v2 = vpop.xlane.xlu0 %592 }
 0x618   : > { %v601_v4 = vmul.f32 %v1349_v43, %v593_v2 }
 0x61a   : > { %v602_v7 = vsub.f32 %v590_v39, %v601_v4 }
 0x61c   : > { %v603_v5 = vmul.f32 %v602_v7, %v602_v7 }
 0x61e   : > { %v604_v6 = vsel %vm242_vm0, %v603_v5, 0.0 }
 0x61f   : > { %605 = vadd.xlane.f32.xlu1 %v604_v6 }
 0x692   : > { %v606_v59 = vpop.xlane.xlu1 %605 }
 0x693   : > { %v607_v60 = vmul.f32 %v606_v59, %v1349_v43 }
 0x695   : > { %v608_v62 = vadd.f32 1e-06, %v607_v60 }
 0x697   : > { %1011 = vrsqrt.f32 %v608_v62  ;;  %vm615_vm6 = vweird.f32 %v608_v62 }
 0x69d   : > { %v1012_v14 = vpop.eup %1011 }
 0x69e   : > { %v610_v15 = vmul.f32 %v1012_v14, %v608_v62  ;;  %vm616_vm5 = vweird.f32 %v1012_v14 }
 0x69f   : > { %vm617_vm7 = vmor %vm615_vm6, %vm616_vm5 }
 0x6a0   : > { %v611_v17 = vmul.f32 %v1012_v14, %v610_v15 }
 0x6a2   : > { %v612_v18 = vmul.f32 0.5, %v611_v17 }
 0x6a4   : > { %v613_v19 = vsub.f32 1.5, %v612_v18 }
 0x6a6   : > { %v614_v20 = vmul.f32 %v1012_v14, %v613_v19 }
 0x6a8   : > { %v618_v22 = vsel %vm617_vm7, %v1012_v14, %v614_v20 }
 0x6a9   : > { %v619_v16 = vmul.f32 %v618_v22, %v602_v7 }
 0x6ab   : > { %v621_v24 = vmul.f32 %v620_v21, %v619_v16 }
 0x6ad   : > { %v623_v25 = vadd.f32 %v622_v23, %v621_v24 }
 0x6af   : > { %892 = vmatmul.msk.f32.vlgmr.msra.gmra.mxu3 %vm242_vm0, %v623_v25 }
 0x732   : > { %v673_v30 = vpop.f32.mrf.mxu3 }
 0x733   : > { %v674_v31 = vadd.f32 %v673_v30, %v624_v29 }
 0x735   : > { %v676_v32 = vmax.f32 %v674_v31, 0.0 }
 0x737   : > { %893 = vmatmul.msk.f32.vlgmr.msrb.gmra.mxu0 %vm686_vm8, %v676_v32 }
 0x7b4   : > { %v707_v34 = vpop.f32.mrf.mxu0 }
 0x7b5   : > { %v708_v35 = vadd.f32 %v707_v34, %v685_v33 }
 0x7b7   : > { %v710_v36 = vadd.f32 %v708_v35, %v623_v25 }
 0x7b9   : > { %v711_v37 = vsel %vm242_vm0, %v710_v36, 0.0 }
 0x7ba   : > { %712 = vadd.xlane.f32.xlu2 %v711_v37 }
 0x82d   : > { %v713_v38 = vpop.xlane.xlu2 %712 }
 0x82e   : > { %v714_v39 = vmul.f32 %v713_v38, %v1349_v43 }
 0x830   : > { %v715_v40 = vsub.f32 %v710_v36, %v714_v39 }
 0x832   : > { %v716_v41 = vmul.f32 %v715_v40, %v715_v40 }
 0x834   : > { %v717_v0 = vsel %vm242_vm0, %v716_v41, 0.0 }
 0x835   : > { %718 = vadd.xlane.f32.xlu0 %v717_v0 }
 0x836   : > { %1042 = shalt.err (!%p1039_p3)
}
 0x837   : > { %s1127_s7 = smov 128   ;;  %s1453_s17 = smov 8   ;;  %v733_v8 = vperm.slane %v1270_v13, 6  ;;  %v735_v10 = vperm.slane %v1270_v13, 7 }
 0x838   : > { %903 = dma.vmem_to_hbm [thread:$0]  (%p1196_p5), %s771_s6, 512, %s773_s8, %s744_s9, %s1127_s7, %s1127_s7, %s1453_s17  }
 0x839   : > { %s872_s10 = sshll.u32 %s1295_s30, 3  ;;  %s896_s23 = sshll.u32 %s1179_s22, 3 }
 0x83a   : > { %s754_s6 = scalar_lea.hbm %s1448_s4, %s896_s23  ;;  %s219_s8 = scalar_lea.vmem [#allocation2], %s872_s10 }
 0x83b   : > { %s756_s9 = sshll.u32 %s219_s8, 4  ;;  %s758_s11 = sshll.u32 %s754_s6, 4  ;;  %s757_s9 = int_to_ptr.vmem [resolvable:$true] %s756_s9  ;;  %s759_s11 = int_to_ptr.hbm [resolvable:$true] %s758_s11 }
 0x83c   : > { %s739_s22 = scalar_lea.sflag [#allocation3], %s1295_s30  ;;  %s1057_s12 = sshra.s32 %s759_s11, 4  ;;  %s1058_s12 = int_to_ptr.hbm [resolvable:$true] %s1057_s12 }
 0x83d   : > { %s1059_s13 = scalar_lea.hbm %s1058_s12, 8  ;;  %s1063_s16 = scalar_lea.hbm %s1448_s4, 16 }
 0x83e   : > { %p1060_p4 = scmp.ne.s32.totalorder %s1058_s12, %s1059_s13  ;;  %p1064_p9 = scmp.lt.s32.totalorder %s1058_s12, %s1448_s4 }
 0x83f   : > { %p1065_p10 = scmp.lt.s32.totalorder %s1063_s16, %s1059_s13 }
 0x840   : > { %p1061_p7 = pnand %p1060_p4, %p1196_p5 }
 0x841   : > { %p1066_p11 = por %p1065_p10, %p1064_p9 }
 0x842   : > { %p1062_p8 = pneg %p1061_p7 }
 0x844   : > { %p1067_p12 = pnand %p1066_p11, %p1062_p8 }
 0x8a8   : > { %v719_v1 = vpop.xlane.xlu0 %718 }
 0x8a9   : > { %v720_v3 = vmul.f32 %v719_v1, %v1349_v43 }
 0x8ab   : > { %v721_v12 = vadd.f32 1e-06, %v720_v3 }
 0x8ad   : > { %1013 = vrsqrt.f32 %v721_v12  ;;  %vm728_vm10 = vweird.f32 %v721_v12 }
 0x8b3   : > { %v1014_v42 = vpop.eup %1013 }
 0x8b4   : > { %v723_v2 = vmul.f32 %v1014_v42, %v721_v12  ;;  %vm729_vm9 = vweird.f32 %v1014_v42 }
 0x8b5   : > { %vm730_vm11 = vmor %vm728_vm10, %vm729_vm9 }
 0x8b6   : > { %v724_v4 = vmul.f32 %v1014_v42, %v723_v2 }
 0x8b8   : > { %v725_v7 = vmul.f32 0.5, %v724_v4 }
 0x8ba   : > { %v726_v5 = vsub.f32 1.5, %v725_v7 }
 0x8bc   : > { %v727_v6 = vmul.f32 %v1014_v42, %v726_v5 }
 0x8be   : > { %v731_v43 = vsel %vm730_vm11, %v1014_v42, %v727_v6 }
 0x8bf   : > { %v732_v9 = vmul.f32 %v731_v43, %v715_v40 }
 0x8c1   : > { %v734_v11 = vmul.f32 %v733_v8, %v732_v9 }
 0x8c3   : > { %v736_v44 = vadd.f32 %v735_v10, %v734_v11 }
 0x8c5   : > { %737 = vst.msk [vmem:[%s219_s8] sm:$0xff] %vm242_vm0, %v736_v44 }
 0x8c6   : > { %1070 = shalt.err (!%p1067_p12)
}
 0x8c7   : > { %902 = dma.vmem_to_hbm [thread:$0]  (%p1196_p5), %s757_s9, 128, %s759_s11, %s739_s22  }
 0x8c8 PF: > { %p913_p13 = scmp.ge.s32.totalorder %s1109_s21, 2  ;;  %s787_s30 = sand.u32 1, %s1097_s18  }
 0x8c9   : > { %s788_s10 = scalar_lea.sflag [#allocation3], %s787_s30 }
 0x8ca   : > { %p907_p0 = pnand %p913_p13, %p1200_p6 }
 0x8cc   : > { %p908_p1 = pneg %p907_p0 }
 0x8ce   : > { %1088 = dma.done.wait (%p908_p1), %s788_s10, 128  }
 0x8cf   : > { %1090 = vsyncadd (%p908_p1), %s788_s10, 4294967168  ;;  %s798_s23 = scalar_lea.sflag [#allocation5], %s787_s30 }
 0x8d0   : > { %1092 = dma.done.wait (%p908_p1), %s798_s23, 512  }
 0x8d1   : > { %1094 = vsyncadd (%p908_p1), %s798_s23, 4294966784  ;;  %p19_p5 = scmp.ge.s32.totalorder %s1183_s24, 4   ;;  %s1454_s18 = smov %s1101_s19 }
 0x8d2   : > { %s1455_s19 = smov %s1105_s20  ;;  %s1456_s20 = smov %s1194_s27 }
 0x8d3   : > { %s1457_s21 = smov %s1183_s24  ;;  %21 = sbr.rel (!%p19_p5) target bundleno = 5 (0x5), region = 91 }
 0x8d8   :  { %804 = vsyncpa [#allocation3], 1 }
 0x8d9   :  { %806 = vsyncpa [#allocation3 + $0x1], 1 }
 0x8da   :  { %807 = vsyncpa [#allocation5], 1 }
 0x8db   :  { %809 = vsyncpa [#allocation5 + $0x1], 1 }

</bundles_post_ra>
